<compile_context>
chip_gen: v6e
topology: v6e:2x2x1
jax: 0.10.0
libtpu: 0.0.40
codegen_flags: <defaults>
</compile_context>

<pallas_src>
import jax
import jax.numpy as jnp
from jax.experimental import pallas as pl
from jax.experimental.pallas import tpu as pltpu

N_LAYERS = 3
OUT_PAD = 128   # lane-dense padded output width


# ---------------------------------------------------------------------------
# Phase 1: node embedding + 3 GraphConv layers (tiny, gridless, f32).
# ---------------------------------------------------------------------------
def node_phase_kernel(node_ref, A_norm_ref, Wn_ref, bn_ref, Wg_ref, bg_ref, h_ref):
    h = jnp.dot(node_ref[...], Wn_ref[...],
                preferred_element_type=jnp.float32) + bn_ref[...]
    A_norm = A_norm_ref[...]
    # Static unroll with static Wg_ref[l] views (keep: zero-cost ref slices,
    # full LLO scheduler visibility; the 3-layer chain is serial anyway).
    for l in range(N_LAYERS):
        agg = jnp.dot(A_norm, h, preferred_element_type=jnp.float32)
        h = jnp.dot(agg, Wg_ref[l], preferred_element_type=jnp.float32) + bg_ref[l]
        h = jnp.maximum(h, 0.0)
    h_ref[...] = h


# ---------------------------------------------------------------------------
# Phase 2: per-edge gather h[src] + h[dst] + output MLP, tiled over E.
# ---------------------------------------------------------------------------
def edge_phase_kernel(src_ref, dst_ref, h_ref, W1_ref, b1_ref, W2_ref, b2_ref,
                      out_ref):
    te = src_ref.shape[0]
    n = h_ref.shape[0]

    # Build the per-tile incidence one-hot in-register from int32 indices.
    # (onehot(src) + onehot(dst)) @ h  ==  h[src] + h[dst]  (== M_tile @ h),
    # without ever DMA'ing a dense [E, N] matrix.
    node_ids = jax.lax.broadcasted_iota(jnp.int32, (te, n), 1)
    src = src_ref[...]                     # [te, 1] int32
    dst = dst_ref[...]                     # [te, 1] int32
    one = jnp.ones((), jnp.bfloat16)
    zero = jnp.zeros((), jnp.bfloat16)
    onehot = (jnp.where(node_ids == src, one, zero) +
              jnp.where(node_ids == dst, one, zero))        # [te, n] bf16 (exact)

    # Gather via MXU, accumulate in f32.
    edge_h = jnp.dot(onehot, h_ref[...], preferred_element_type=jnp.float32)

    # Output MLP: Linear -> ReLU -> Linear (bf16 operands, f32 accumulate).
    mid = jnp.maximum(
        jnp.dot(edge_h.astype(jnp.bfloat16), W1_ref[...],
                preferred_element_type=jnp.float32) + b1_ref[...],
        0.0)
    out_ref[...] = jnp.dot(mid.astype(jnp.bfloat16), W2_ref[...],
                           preferred_element_type=jnp.float32) + b2_ref[...]


# ---------------------------------------------------------------------------
# Wrapper
# ---------------------------------------------------------------------------
def tspdl_edge_forward(node_feats, edge_feats, src, dst, A, params, *, te=128):
    """edge_feats is accepted for API parity with the PyTorch module but its
    embedding is dead (overwritten by apply_edges), so it is never sent to TPU."""
    del edge_feats  # dead path in the original module

    N = node_feats.shape[0]
    D = params["Wn"].shape[1]
    out_dim = params["W2"].shape[1]

    # GraphConv norm='both' scaling precomputed outside the kernel.
    in_deg = jnp.maximum(jnp.sum(A, axis=1, keepdims=True), 1.0)    # [N, 1]
    out_deg = jnp.maximum(jnp.sum(A, axis=0, keepdims=True), 1.0)   # [1, N]
    A_norm = (A * jax.lax.rsqrt(in_deg) * jax.lax.rsqrt(out_deg)).astype(jnp.float32)

    # --- phase 1: node features -> h  (tiny, whole arrays in VMEM) ---
    vmem = pl.BlockSpec(memory_space=pltpu.MemorySpace.VMEM)
    h = pl.pallas_call(
        node_phase_kernel,
        out_shape=jax.ShapeDtypeStruct((N, D), jnp.float32),
        in_specs=[vmem] * 6,
        out_specs=vmem,
    )(node_feats, A_norm, params["Wn"], params["bn"], params["Wg"], params["bg"])

    # --- phase 2: E-tiled edge predictions ---
    E = src.shape[0]
    E_pad = ((E + te - 1) // te) * te
    src_p = jnp.zeros((E_pad, 1), jnp.int32).at[:E, 0].set(src)
    dst_p = jnp.zeros((E_pad, 1), jnp.int32).at[:E, 0].set(dst)

    # bf16 MXU operands (weights cast once on host side, not per grid step).
    h_bf = h.astype(jnp.bfloat16)
    W1_bf = params["W1"].astype(jnp.bfloat16)
    W2p = jnp.zeros((D, OUT_PAD), jnp.float32).at[:, :out_dim].set(params["W2"])
    W2p_bf = W2p.astype(jnp.bfloat16)
    b2p = jnp.zeros((1, OUT_PAD), jnp.float32).at[:, :out_dim].set(params["b2"])

    grid = (E_pad // te,)
    out_p = pl.pallas_call(
        edge_phase_kernel,
        out_shape=jax.ShapeDtypeStruct((E_pad, OUT_PAD), jnp.float32),
        grid_spec=pltpu.PrefetchScalarGridSpec(
            num_scalar_prefetch=0,
            grid=grid,
            in_specs=[
                pl.BlockSpec((te, 1), lambda i: (i, 0)),        # src
                pl.BlockSpec((te, 1), lambda i: (i, 0)),        # dst
                pl.BlockSpec((N, D), lambda i: (0, 0)),         # h (resident)
                pl.BlockSpec((D, D), lambda i: (0, 0)),         # W1
                pl.BlockSpec((1, D), lambda i: (0, 0)),         # b1
                pl.BlockSpec((D, OUT_PAD), lambda i: (0, 0)),   # W2 (padded)
                pl.BlockSpec((1, OUT_PAD), lambda i: (0, 0)),   # b2 (padded)
            ],
            out_specs=pl.BlockSpec((te, OUT_PAD), lambda i: (i, 0)),
        ),
        compiler_params=pltpu.CompilerParams(
            dimension_semantics=("parallel",),
            vmem_limit_bytes=32 * 1024 * 1024,   # tiles sized well under v7x 64 MiB
        ),
    )(src_p, dst_p, h_bf, W1_bf, params["b1"], W2p_bf, b2p)

    return out_p[:E, :out_dim]


# ---------------------------------------------------------------------------
# Pure-JAX reference mirroring the PyTorch/DGL math (f32).
# ---------------------------------------------------------------------------
def reference_forward(node_feats, src, dst, A, params):
    h = node_feats @ params["Wn"] + params["bn"]
    in_deg = jnp.maximum(jnp.sum(A, axis=1, keepdims=True), 1.0)
    out_deg = jnp.maximum(jnp.sum(A, axis=0, keepdims=True), 1.0)
    A_norm = A * jax.lax.rsqrt(in_deg) * jax.lax.rsqrt(out_deg)
    for l in range(N_LAYERS):
        h = jnp.maximum(A_norm @ h @ params["Wg"][l] + params["bg"][l], 0.0)
    edge_h = h[src] + h[dst]
    mid = jnp.maximum(edge_h @ params["W1"] + params["b1"], 0.0)
    return mid @ params["W2"] + params["b2"]


if __name__ == "__main__":
    key = jax.random.PRNGKey(0)
    N, in_dim, embed_dim, out_dim = 8, 4, 32, 1

    # Complete directed graph, no self loops (typical TSP edge graph).
    src_l, dst_l = [], []
    for s in range(N):
        for d in range(N):
            if s != d:
                src_l.append(s)
                dst_l.append(d)
    src = jnp.array(src_l, jnp.int32)
    dst = jnp.array(dst_l, jnp.int32)
    E = int(src.shape[0])

    # Dense adjacency (A[dst, src]) — only used for the GraphConv normalization.
    A = jnp.zeros((N, N), jnp.float32).at[dst, src].add(1.0)

    keys = jax.random.split(key, 12)

    def w(k, shape, scale=0.1):
        return (scale * jax.random.normal(k, shape)).astype(jnp.float32)

    params = dict(
        # We / be mirror the module's (dead) edge_embedding parameters; never used.
        We=w(keys[0], (in_dim, embed_dim)), be=w(keys[1], (1, embed_dim)),
        Wn=w(keys[2], (4, embed_dim)),      bn=w(keys[3], (1, embed_dim)),
        Wg=w(keys[4], (N_LAYERS, embed_dim, embed_dim)),
        bg=w(keys[5], (N_LAYERS, 1, embed_dim)),
        W1=w(keys[6], (embed_dim, embed_dim)), b1=w(keys[7], (1, embed_dim)),
        W2=w(keys[8], (embed_dim, out_dim)),   b2=w(keys[9], (1, out_dim)),
    )

    node_feats = jax.random.normal(keys[10], (N, 4), jnp.float32)
    edge_feats = jax.random.normal(keys[11], (E, in_dim), jnp.float32)

    # TODO(synk): multi-instance batching (stack graphs along the row axis /
    # batch grid dim) would amortize per-call overhead further at this toy size.
    out = tspdl_edge_forward(node_feats, edge_feats, src, dst, A, params)
    out = jax.block_until_ready(out)

    ref = reference_forward(node_feats, src, dst, A, params)
    assert out.shape == (E, out_dim)
    assert jnp.allclose(out, ref, rtol=2e-2, atol=2e-2), \
        float(jnp.max(jnp.abs(out - ref)))

    print("KERNEL_OK")
</pallas_src>

<mosaic_0001>
module attributes {stable_mosaic.version = 11 : i64} {
  func.func @node_phase_kernel(%arg0: memref<8x4xf32, #tpu.memory_space<vmem>>, %arg1: memref<8x8xf32, #tpu.memory_space<vmem>>, %arg2: memref<4x32xf32, #tpu.memory_space<vmem>>, %arg3: memref<1x32xf32, #tpu.memory_space<vmem>>, %arg4: memref<3x32x32xf32, #tpu.memory_space<vmem>>, %arg5: memref<3x1x32xf32, #tpu.memory_space<vmem>>, %arg6: memref<8x32xf32, #tpu.memory_space<vmem>>) attributes {dimension_semantics = [], scalar_prefetch = 0 : i64, scratch_operands = 0 : i64, tpu.core_type = #tpu.core_type<tc>} {
    %c0 = arith.constant 0 : index
    %c0_0 = arith.constant 0 : index
    %0 = vector.load %arg0[%c0, %c0_0] : memref<8x4xf32, #tpu.memory_space<vmem>>, vector<8x4xf32>
    %c0_1 = arith.constant 0 : index
    %c0_2 = arith.constant 0 : index
    %1 = vector.load %arg2[%c0_1, %c0_2] : memref<4x32xf32, #tpu.memory_space<vmem>>, vector<4x32xf32>
    %cst = arith.constant dense<0.000000e+00> : vector<8x32xf32>
    %2 = tpu.matmul %0, %1, %cst {dimension_numbers = #tpu.dot_dimension_numbers<[1], [0], [0], [1], [0, 0, 1, 1], [], []>} : vector<8x4xf32>, vector<4x32xf32>, vector<8x32xf32> -> vector<8x32xf32>
    %c0_3 = arith.constant 0 : index
    %c0_4 = arith.constant 0 : index
    %3 = vector.load %arg3[%c0_3, %c0_4] : memref<1x32xf32, #tpu.memory_space<vmem>>, vector<1x32xf32>
    %4 = vector.broadcast %3 : vector<1x32xf32> to vector<8x32xf32>
    %5 = arith.addf %2, %4 : vector<8x32xf32>
    %c0_5 = arith.constant 0 : index
    %c0_6 = arith.constant 0 : index
    %6 = vector.load %arg1[%c0_5, %c0_6] : memref<8x8xf32, #tpu.memory_space<vmem>>, vector<8x8xf32>
    %cst_7 = arith.constant dense<0.000000e+00> : vector<8x32xf32>
    %7 = tpu.matmul %6, %5, %cst_7 {dimension_numbers = #tpu.dot_dimension_numbers<[1], [0], [0], [1], [0, 0, 1, 1], [], []>} : vector<8x8xf32>, vector<8x32xf32>, vector<8x32xf32> -> vector<8x32xf32>
    %c0_8 = arith.constant 0 : index
    %c0_9 = arith.constant 0 : index
    %c0_10 = arith.constant 0 : index
    %8 = vector.load %arg4[%c0_8, %c0_9, %c0_10] : memref<3x32x32xf32, #tpu.memory_space<vmem>>, vector<1x32x32xf32>
    %9 = vector.shape_cast %8 : vector<1x32x32xf32> to vector<32x32xf32>
    %cst_11 = arith.constant dense<0.000000e+00> : vector<8x32xf32>
    %10 = tpu.matmul %7, %9, %cst_11 {dimension_numbers = #tpu.dot_dimension_numbers<[1], [0], [0], [1], [0, 0, 1, 1], [], []>} : vector<8x32xf32>, vector<32x32xf32>, vector<8x32xf32> -> vector<8x32xf32>
    %c0_12 = arith.constant 0 : index
    %c0_13 = arith.constant 0 : index
    %c0_14 = arith.constant 0 : index
    %11 = vector.load %arg5[%c0_12, %c0_13, %c0_14] : memref<3x1x32xf32, #tpu.memory_space<vmem>>, vector<1x1x32xf32>
    %12 = vector.shape_cast %11 : vector<1x1x32xf32> to vector<1x32xf32>
    %13 = vector.broadcast %12 : vector<1x32xf32> to vector<8x32xf32>
    %14 = arith.addf %10, %13 : vector<8x32xf32>
    %cst_15 = arith.constant 0.000000e+00 : f32
    %15 = vector.broadcast %cst_15 : f32 to vector<8x32xf32>
    %16 = arith.maximumf %14, %15 : vector<8x32xf32>
    %cst_16 = arith.constant dense<0.000000e+00> : vector<8x32xf32>
    %17 = tpu.matmul %6, %16, %cst_16 {dimension_numbers = #tpu.dot_dimension_numbers<[1], [0], [0], [1], [0, 0, 1, 1], [], []>} : vector<8x8xf32>, vector<8x32xf32>, vector<8x32xf32> -> vector<8x32xf32>
    %c1 = arith.constant 1 : index
    %c0_17 = arith.constant 0 : index
    %c0_18 = arith.constant 0 : index
    %18 = vector.load %arg4[%c1, %c0_17, %c0_18] : memref<3x32x32xf32, #tpu.memory_space<vmem>>, vector<1x32x32xf32>
    %19 = vector.shape_cast %18 : vector<1x32x32xf32> to vector<32x32xf32>
    %cst_19 = arith.constant dense<0.000000e+00> : vector<8x32xf32>
    %20 = tpu.matmul %17, %19, %cst_19 {dimension_numbers = #tpu.dot_dimension_numbers<[1], [0], [0], [1], [0, 0, 1, 1], [], []>} : vector<8x32xf32>, vector<32x32xf32>, vector<8x32xf32> -> vector<8x32xf32>
    %c1_20 = arith.constant 1 : index
    %c0_21 = arith.constant 0 : index
    %c0_22 = arith.constant 0 : index
    %21 = vector.load %arg5[%c1_20, %c0_21, %c0_22] : memref<3x1x32xf32, #tpu.memory_space<vmem>>, vector<1x1x32xf32>
    %22 = vector.shape_cast %21 : vector<1x1x32xf32> to vector<1x32xf32>
    %23 = vector.broadcast %22 : vector<1x32xf32> to vector<8x32xf32>
    %24 = arith.addf %20, %23 : vector<8x32xf32>
    %cst_23 = arith.constant 0.000000e+00 : f32
    %25 = vector.broadcast %cst_23 : f32 to vector<8x32xf32>
    %26 = arith.maximumf %24, %25 : vector<8x32xf32>
    %cst_24 = arith.constant dense<0.000000e+00> : vector<8x32xf32>
    %27 = tpu.matmul %6, %26, %cst_24 {dimension_numbers = #tpu.dot_dimension_numbers<[1], [0], [0], [1], [0, 0, 1, 1], [], []>} : vector<8x8xf32>, vector<8x32xf32>, vector<8x32xf32> -> vector<8x32xf32>
    %c2 = arith.constant 2 : index
    %c0_25 = arith.constant 0 : index
    %c0_26 = arith.constant 0 : index
    %28 = vector.load %arg4[%c2, %c0_25, %c0_26] : memref<3x32x32xf32, #tpu.memory_space<vmem>>, vector<1x32x32xf32>
    %29 = vector.shape_cast %28 : vector<1x32x32xf32> to vector<32x32xf32>
    %cst_27 = arith.constant dense<0.000000e+00> : vector<8x32xf32>
    %30 = tpu.matmul %27, %29, %cst_27 {dimension_numbers = #tpu.dot_dimension_numbers<[1], [0], [0], [1], [0, 0, 1, 1], [], []>} : vector<8x32xf32>, vector<32x32xf32>, vector<8x32xf32> -> vector<8x32xf32>
    %c2_28 = arith.constant 2 : index
    %c0_29 = arith.constant 0 : index
    %c0_30 = arith.constant 0 : index
    %31 = vector.load %arg5[%c2_28, %c0_29, %c0_30] : memref<3x1x32xf32, #tpu.memory_space<vmem>>, vector<1x1x32xf32>
    %32 = vector.shape_cast %31 : vector<1x1x32xf32> to vector<1x32xf32>
    %33 = vector.broadcast %32 : vector<1x32xf32> to vector<8x32xf32>
    %34 = arith.addf %30, %33 : vector<8x32xf32>
    %cst_31 = arith.constant 0.000000e+00 : f32
    %35 = vector.broadcast %cst_31 : f32 to vector<8x32xf32>
    %36 = arith.maximumf %34, %35 : vector<8x32xf32>
    %c0_32 = arith.constant 0 : index
    %c0_33 = arith.constant 0 : index
    %37 = vector.load %arg6[%c0_32, %c0_33] : memref<8x32xf32, #tpu.memory_space<vmem>>, vector<8x32xf32>
    tpu.vector_store %arg6[%c0_32, %c0_33], %36 {strides = array<i32>} : memref<8x32xf32, #tpu.memory_space<vmem>>, vector<8x32xf32>,
    return
  }
}

</mosaic_0001>

<bundles_post_ra>
// kernel: tpu_custom_call.1
= control target key start
LH: loop header
LB: loop body
LE: loop exit
PB: predicated region body
PF: predicated region fallthrough
CT: control target
= control target key end

     0   :  { %11 = vsyncpa [#allocation3], 0  ;;  %s861_s0 = inlined_call_operand.vmem [shape: f32[8,4], index: 0, kind: input, shape index: {}]   ;;  %s862_s1 = inlined_call_operand.vmem [shape: f32[8,8], index: 1, kind: input, shape index: {}]   ;;  %s863_s2 = inlined_call_operand.vmem [shape: f32[4,32], index: 2, kind: input, shape index: {}]   ;;  %s864_s3 = inlined_call_operand.vmem [shape: f32[1,32], index: 3, kind: input, shape index: {}]   ;;  %s865_s4 = inlined_call_operand.hbm [shape: f32[3,32,32], index: 4, kind: input, shape index: {}]   ;;  %s866_s5 = inlined_call_operand.vmem [shape: f32[3,1,32], index: 5, kind: input, shape index: {}]   ;;  %s867_s6 = inlined_call_operand.hbm [shape: f32[8,32], index: 6, kind: output, shape index: {}]  }
   0x1   :  { %12 = vsyncpa [#allocation4], 0  ;;  %s756_s21 = smov [#allocation2]  }
   0x2   :  { %s26_s22 = sshll.u32 %s756_s21, 4  ;;  %s27_s22 = int_to_ptr.vmem [resolvable:$true] %s26_s22 }
   0x3   :  { %s720_s23 = scalar_lea.vmem %s27_s22, 1536  ;;  %p725_p1 = scmp.lt.s32.totalorder %s27_s22, %s27_s22 }
   0x4   :  { %p721_p0 = scmp.ne.s32.totalorder %s27_s22, %s720_s23  ;;  %p726_p2 = scmp.lt.s32.totalorder %s720_s23, %s720_s23 }
   0x6   :  { %p727_p3 = por %p726_p2, %p725_p1 }
   0x8   :  { %p728_p4 = pnand %p727_p3, %p721_p0 }
   0xa   :  { %731 = shalt.err (!%p728_p4)
}
   0xb   :  { %s757_s24 = smov 128   ;;  %s758_s25 = smov 8  }
   0xc   :  { %32 = dma.hbm_to_vmem [thread:$0]  %s865_s4, 1536, %s27_s22, [#allocation3], %s757_s24, %s757_s24, %s758_s25  }
   0xd   :  { %752 = dma.done.wait [#allocation3], 1536  }
   0xe   :  { %753 = vsyncadd [#allocation3], 4294965760  ;;  %v759_v0 = vmov 0.0   ;;  %vm760_vm0 = vmmov 0   ;;  %vm51_vm1 = vcmask 1043456   ;;  %vm47_vm2 = vcmask 31744  }
   0xf   :  { %653 = vmatprep.subr.mxu0 %v759_v0  ;;  %655 = vmatprep.mubr.msk.f32.mxu0 %vm760_vm0, %v759_v0  ;;  %v39_v1 = vld [vmem:[%s863_s2] sm:$0xf]  ;;  %v203_v3 = vld [vmem:[#allocation2 + $0x18] sm:$0xff]  ;;  %v202_v4 = vld [vmem:[#allocation2 + $0x10] sm:$0xff]  ;;  %vm126_vm3 = vcmask 64512   ;;  %vm211_vm4 = vcmask 261120  }
  0x10   :  { %658 = vmatprep.subr.mxu1 %v759_v0  ;;  %660 = vmatprep.mubr.msk.f32.mxu1 %vm760_vm0, %v759_v0  ;;  %v38_v2 = vld [vmem:[%s861_s0] sm:$0xff]  ;;  %v201_v5 = vld [vmem:[#allocation2 + $0x8] sm:$0xff]  ;;  %v360_v19 = vld [vmem:[#allocation2 + $0x38] sm:$0xff]  ;;  %s761_s13 = smov [#allocation5]  }
  0x11   :  { %654 = vmatpush3.msk.msra.mxu0 %vm51_vm1, %v39_v1  ;;  %v616_v6 = vld [vmem:[%s864_s3] ss:$0 sm:$0xff]  ;;  %v359_v20 = vld [vmem:[#allocation2 + $0x30] sm:$0xff]  ;;  %v358_v21 = vld [vmem:[#allocation2 + $0x28] sm:$0xff]  ;;  %s607_s14 = sshll.u32 %s761_s13, 4  ;;  %s608_s14 = int_to_ptr.vmem [resolvable:$true] %s607_s14 }
  0x12   :  { %656 = vmatmul.mubr.msk.f32.vlgmr.msra.gmra.mxu0 %vm47_vm2, %v38_v2  ;;  %663 = vmatprep.subr.mxu0 %v759_v0  ;;  %v125_v9 = vld [vmem:[%s862_s1] sm:$0xff]  ;;  %v517_v25 = vld [vmem:[#allocation2 + $0x58] sm:$0xff]  ;;  %v516_v26 = vld [vmem:[#allocation2 + $0x50] sm:$0xff]  ;;  %s732_s15 = scalar_lea.vmem %s608_s14, 128  ;;  %p737_p6 = scmp.lt.s32.totalorder %s608_s14, %s608_s14 }
  0x13   :  { %671 = vmatprep.mubr.msk.f32.mxu0 %vm760_vm0, %v759_v0  ;;  %664 = vmatpush3.msra.mxu0 %v203_v3  ;;  %v200_v11 = vld [vmem:[#allocation2] sm:$0xff]  ;;  %v515_v27 = vld [vmem:[#allocation2 + $0x48] sm:$0xff]  ;;  %p733_p5 = scmp.ne.s32.totalorder %s608_s14, %s732_s15  ;;  %p738_p7 = scmp.lt.s32.totalorder %s732_s15, %s732_s15 }
  0x14   :  { %665 = vmatprep.subr.mxu0 %v759_v0  ;;  %v620_v14 = vld [vmem:[%s866_s5] ss:$0 sm:$0xff]  ;;  %v624_v28 = vld [vmem:[%s866_s5 + $0x1] ss:$0 sm:$0xff]  ;;  %v628_v36 = vld [vmem:[%s866_s5 + $0x2] ss:$0 sm:$0xff] }
  0x15   :  { %666 = vmatpush3.msra.mxu0 %v202_v4  ;;  %v357_v22 = vld [vmem:[#allocation2 + $0x20] sm:$0xff]  ;;  %p739_p8 = por %p738_p7, %p737_p6 }
  0x16   :  { %667 = vmatprep.subr.mxu0 %v759_v0  ;;  %v514_v33 = vld [vmem:[#allocation2 + $0x40] sm:$0xff] }
  0x17   :  { %668 = vmatpush3.msra.mxu0 %v201_v5  ;;  %p740_p9 = pnand %p739_p8, %p733_p5 }
  0x18   :  { %669 = vmatprep.subr.mxu0 %v759_v0 }
  0x19   :  { %670 = vmatpush3.msra.mxu0 %v200_v11 }
  0x1a   :  { %695 = vmatprep.subr.mxu0 %v759_v0 }
  0xd2   :  { %v121_v7 = vpop.f32.mrf.mxu0 }
  0xd3   :  { %v122_v8 = vadd.f32 %v616_v6, %v121_v7 }
  0xd4   :  { %v657_v10 = vpop.f32.mrf.mxu0 }
  0xd5   :  { %659 = vmatpush3.msra.mxu1 %v122_v8 }
  0xd6   :  { %661 = vmatmul.mubr.msk.f32.vlgmr.msra.gmra.mxu1 %vm126_vm3, %v125_v9  ;;  %674 = vmatprep.subr.mxu1 %v759_v0 }
  0xd7   :  { %676 = vmatprep.mubr.msk.f32.mxu1 %vm760_vm0, %v759_v0 }
 0x196   :  { %v196_v12 = vpop.f32.mrf.mxu1 }
 0x197   :  { %672 = vmatmul.mubr.msk.f32.vlgmr.msra.gmra.mxu0 %vm211_vm4, %v196_v12 }
 0x198   :  { %v662_v13 = vpop.f32.mrf.mxu1  ;;  %703 = vmatprep.mubr.msk.f32.mxu0 %vm760_vm0, %v759_v0  ;;  %696 = vmatpush3.msra.mxu0 %v517_v25 }
 0x199   :  { %697 = vmatprep.subr.mxu0 %v759_v0 }
 0x19a   :  { %698 = vmatpush3.msra.mxu0 %v516_v26 }
 0x19b   :  { %699 = vmatprep.subr.mxu0 %v759_v0 }
 0x19c   :  { %700 = vmatpush3.msra.mxu0 %v515_v27 }
 0x19d   :  { %701 = vmatprep.subr.mxu0 %v759_v0 }
 0x19e   :  { %702 = vmatpush3.msra.mxu0 %v514_v33 }
 0x257   :  { %v281_v15 = vpop.f32.mrf.mxu0 }
 0x258   :  { %v282_v16 = vadd.f32 %v620_v14, %v281_v15 }
 0x259   :  { %v673_v17 = vpop.f32.mrf.mxu0 }
 0x25a   :  { %v285_v18 = vmax.f32 %v282_v16, 0.0 }
 0x25c   :  { %675 = vmatpush3.msra.mxu1 %v285_v18 }
 0x25d   :  { %677 = vmatmul.mubr.msk.f32.vlgmr.msra.gmra.mxu1 %vm126_vm3, %v125_v9  ;;  %679 = vmatprep.subr.mxu1 %v759_v0 }
 0x25e   :  { %680 = vmatpush3.msra.mxu1 %v360_v19  ;;  %687 = vmatprep.mubr.msk.f32.mxu1 %vm760_vm0, %v759_v0 }
 0x25f   :  { %681 = vmatprep.subr.mxu1 %v759_v0 }
 0x260   :  { %682 = vmatpush3.msra.mxu1 %v359_v20 }
 0x261   :  { %683 = vmatprep.subr.mxu1 %v759_v0 }
 0x262   :  { %684 = vmatpush3.msra.mxu1 %v358_v21 }
 0x263   :  { %685 = vmatprep.subr.mxu1 %v759_v0 }
 0x264   :  { %686 = vmatpush3.msra.mxu1 %v357_v22 }
 0x265   :  { %690 = vmatprep.subr.mxu1 %v759_v0 }
 0x31d   :  { %v352_v23 = vpop.f32.mrf.mxu1 }
 0x31e   :  { %688 = vmatmul.mubr.msk.f32.vlgmr.msra.gmra.mxu1 %vm211_vm4, %v352_v23 }
 0x31f   :  { %v678_v24 = vpop.f32.mrf.mxu1  ;;  %692 = vmatprep.mubr.msk.f32.mxu1 %vm760_vm0, %v759_v0 }
 0x3de   :  { %v438_v29 = vpop.f32.mrf.mxu1 }
 0x3df   :  { %v439_v30 = vadd.f32 %v624_v28, %v438_v29 }
 0x3e0   :  { %v689_v31 = vpop.f32.mrf.mxu1 }
 0x3e1   :  { %v442_v32 = vmax.f32 %v439_v30, 0.0 }
 0x3e3   :  { %691 = vmatpush3.msra.mxu1 %v442_v32 }
 0x3e4   :  { %693 = vmatmul.mubr.msk.f32.vlgmr.msra.gmra.mxu1 %vm126_vm3, %v125_v9 }
 0x4a4   :  { %v509_v34 = vpop.f32.mrf.mxu1 }
 0x4a5   :  { %704 = vmatmul.mubr.msk.f32.vlgmr.msra.gmra.mxu0 %vm211_vm4, %v509_v34 }
 0x4a6   :  { %v694_v35 = vpop.f32.mrf.mxu1 }
 0x565   :  { %v595_v37 = vpop.f32.mrf.mxu0 }
 0x566   :  { %v596_v38 = vadd.f32 %v628_v36, %v595_v37 }
 0x567   :  { %v705_v39 = vpop.f32.mrf.mxu0 }
 0x568   :  { %v599_v40 = vmax.f32 %v596_v38, 0.0 }
 0x56a   :  { %600 = vst.msk [vmem:[#allocation5] sm:$0xff] %vm211_vm4, %v599_v40 }
 0x56b   :  { %743 = shalt.err (!%p740_p9)
}
 0x56c   :  { %610 = dma.vmem_to_hbm [thread:$0]  %s608_s14, 128, %s867_s6, [#allocation4]  }
 0x56d   :  { %754 = dma.done.wait [#allocation4], 128  }
 0x56e   :  { %755 = vsyncadd [#allocation4], 4294967168 }
 0x56f   :  { %614 = vsyncpa [#allocation3], 1 }
 0x570   :  { %615 = vsyncpa [#allocation4], 1 }

</bundles_post_ra>
